<compile_context>
chip_gen: v6e
topology: v6e:2x2x1
jax: 0.10.0
libtpu: 0.0.40
codegen_flags: <defaults>
</compile_context>

<pallas_src>
import jax
import jax.numpy as jnp
from jax.experimental import pallas as pl
from jax.experimental.pallas import tpu as pltpu


def _round_up(x, m):
    return (x + m - 1) // m * m


def _choose_tiles(B, D, itemsize):
    """Pick (TB, Bp): batch tile (multiple of 128) and padded batch (= TB * steps)."""
    Bp0 = _round_up(max(int(B), 1), 128)
    d_pad = _round_up(int(D), 128)            # VMEM lane padding of a (TB, D) tile

    # ~1 MiB of real feature bytes per input per step amortizes the ~0.35 us
    # fixed per-grid-step overhead (keeps us near the HBM roofline).
    tb_target = max((1 << 20) // max(D * itemsize, 1), 128)
    # Double-buffered feature VMEM: 2 inputs x 2 buffers x TB x d_pad x itemsize.
    # <= ~12 MiB keeps the default scoped-VMEM limit safe even on v5e (16 MiB).
    tb_vmem = max((12 << 20) // (4 * d_pad * itemsize), 128)
    preferred = max(128, (min(tb_target, tb_vmem, 1 << 14) // 128) * 128)

    # Number of grid steps: enough to keep tiles near `preferred`, and >= 2
    # whenever possible so v7x's two TensorCores both get work.
    steps = max(1, -(-Bp0 // preferred))
    if Bp0 >= 256:
        steps = max(steps, 2)
    tb = _round_up(-(-Bp0 // steps), 128)     # per-step tile, multiple of 128
    return tb, tb * steps


def _fm_kernel(gb_ref, uf_ref, if_ref, bias_ref, pred_ref, cvr_ref):
    # (TB, D) feature tiles in native dtype (e.g. bf16); upcast, accumulate f32.
    u = uf_ref[...].astype(jnp.float32)
    v = if_ref[...].astype(jnp.float32)
    w = u * v                                                     # (TB, D) f32

    # Per-row dot product, produced directly in lane-dense (1, TB) layout:
    # ones(1, D) contracted against w's last dim (q@k^T-style dot_general) on
    # the MXU, which is idle in this HBM-bound kernel.  No skinny transpose,
    # bias adds are full-vreg VPU ops, stores are unmasked lane-dense vst.
    ones_row = jnp.ones((1, w.shape[1]), jnp.float32)
    dot_row = jax.lax.dot_general(
        ones_row, w,
        dimension_numbers=(((1,), (1,)), ((), ())),
        preferred_element_type=jnp.float32,
    )                                                             # (1, TB)

    pred = dot_row + bias_ref[...] + gb_ref[0, 0]                 # (1, TB)
    pred_ref[...] = pred

    # Exact sigmoid; for very negative pred, exp(-pred) -> +inf and 1/inf = 0.
    cvr_ref[...] = 1.0 / (1.0 + jnp.exp(-pred))


def _fm_predict_padded(global_bias, user_feat, item_feat, bias_row, tb):
    """user_feat/item_feat: (Bp, D) (any float dtype); bias_row: (1, Bp) f32."""
    Bp, D = user_feat.shape
    assert Bp % tb == 0
    gb = global_bias.astype(jnp.float32).reshape(1, 1)

    return pl.pallas_call(
        _fm_kernel,
        out_shape=(
            jax.ShapeDtypeStruct((1, Bp), jnp.float32),
            jax.ShapeDtypeStruct((1, Bp), jnp.float32),
        ),
        grid=(Bp // tb,),
        in_specs=[
            # Global-bias scalar lives untiled in SMEM, visible to every step.
            pl.BlockSpec(memory_space=pltpu.MemorySpace.SMEM),
            pl.BlockSpec((tb, D), lambda i: (i, 0)),   # user features (streamed)
            pl.BlockSpec((tb, D), lambda i: (i, 0)),   # item features (streamed)
            pl.BlockSpec((1, tb), lambda i: (0, i)),   # user_bias+item_bias row
        ],
        out_specs=(
            pl.BlockSpec((1, tb), lambda i: (0, i)),   # pred, lane-dense
            pl.BlockSpec((1, tb), lambda i: (0, i)),   # cvr, lane-dense
        ),
        compiler_params=pltpu.CompilerParams(
            # Batch tiles are independent: shard across TensorCores on v7x.
            dimension_semantics=("parallel",),
        ),
    )(gb, user_feat, item_feat, bias_row)


def drbiasfm_forward(params, user_id, item_id):
    """Equivalent of drBiasFM.forward(user_id, item_id) -> (pred, cvr)."""
    B = user_id.shape[0]
    table_u = params["user_factors"]
    table_i = params["item_factors"]
    D = table_u.shape[1]
    itemsize = jnp.dtype(table_u.dtype).itemsize
    tb, Bp = _choose_tiles(B, D, itemsize)

    # Pad the cheap int32 id vectors (index 0 is always valid) rather than the
    # gathered (B, D) matrices: the gather emits padded (Bp, D) directly.
    pad = Bp - B
    uid = jnp.pad(user_id, (0, pad)) if pad else user_id
    iid = jnp.pad(item_id, (0, pad)) if pad else item_id

    # Glue: embedding-table gathers stay in plain JAX (see TODO in the header).
    uf = jnp.take(table_u, uid, axis=0)                          # (Bp, D)
    itf = jnp.take(table_i, iid, axis=0)                         # (Bp, D)
    bias_row = (jnp.take(params["user_bias"], uid, axis=0)
                + jnp.take(params["item_bias"], iid, axis=0)
                ).astype(jnp.float32).reshape(1, Bp)             # (1, Bp)

    pred_row, cvr_row = _fm_predict_padded(params["global_bias"], uf, itf,
                                           bias_row, tb)
    return pred_row[0, :B], cvr_row[0, :B]


def init_params(key, num_users, num_items, embedding_size,
                factor_dtype=jnp.bfloat16):
    k = jax.random.split(key, 5)
    return {
        # torch: Embedding.weight.data.normal_(std=0.3).  Stored in bf16 to
        # halve the dominant HBM feature-read bytes; upcast to f32 in-kernel.
        "user_factors": (0.3 * jax.random.normal(
            k[0], (num_users, embedding_size), jnp.float32)).astype(factor_dtype),
        "item_factors": (0.3 * jax.random.normal(
            k[1], (num_items, embedding_size), jnp.float32)).astype(factor_dtype),
        # torch: torch.randn(...)
        "user_bias": jax.random.normal(k[2], (num_users,), jnp.float32),
        "item_bias": jax.random.normal(k[3], (num_items,), jnp.float32),
        "global_bias": jax.random.normal(k[4], (1,), jnp.float32),
    }


if __name__ == "__main__":
    key = jax.random.PRNGKey(0)
    num_users, num_items, embedding_size = 16, 16, 32
    batch = 8

    pkey, ukey, ikey = jax.random.split(key, 3)
    params = init_params(pkey, num_users, num_items, embedding_size)
    user_id = jax.random.randint(ukey, (batch,), 0, num_users, dtype=jnp.int32)
    item_id = jax.random.randint(ikey, (batch,), 0, num_items, dtype=jnp.int32)

    pred, cvr = drbiasfm_forward(params, user_id, item_id)
    jax.block_until_ready((pred, cvr))

    # Pure-JAX reference of the forward semantics (same stored parameters).
    uf = jnp.take(params["user_factors"], user_id, axis=0).astype(jnp.float32)
    itf = jnp.take(params["item_factors"], item_id, axis=0).astype(jnp.float32)
    pred_ref = (uf * itf).sum(axis=1) \
        + params["user_bias"][user_id] + params["item_bias"][item_id] \
        + params["global_bias"]
    cvr_ref = jax.nn.sigmoid(pred_ref)

    assert pred.shape == (batch,) and cvr.shape == (batch,)
    assert jnp.allclose(pred, pred_ref, atol=1e-4, rtol=1e-4), \
        f"pred mismatch: {jnp.max(jnp.abs(pred - pred_ref))}"
    assert jnp.allclose(cvr, cvr_ref, atol=1e-4, rtol=1e-4), \
        f"cvr mismatch: {jnp.max(jnp.abs(cvr - cvr_ref))}"

    print("KERNEL_OK")
</pallas_src>

<mosaic_0001>
module attributes {stable_mosaic.version = 11 : i64} {
  func.func @_fm_kernel(%arg0: i32, %arg1: memref<1x1xf32, #tpu.memory_space<smem>>, %arg2: memref<128x32xbf16, #tpu.memory_space<vmem>>, %arg3: memref<128x32xbf16, #tpu.memory_space<vmem>>, %arg4: memref<1x128xf32, #tpu.memory_space<vmem>>, %arg5: memref<1x128xf32, #tpu.memory_space<vmem>>, %arg6: memref<1x128xf32, #tpu.memory_space<vmem>>) attributes {dimension_semantics = [#tpu.dimension_semantics<parallel>], iteration_bounds = array<i64: 1>, scalar_prefetch = 0 : i64, scratch_operands = 0 : i64, tpu.core_type = #tpu.core_type<tc>, window_params = [{transform_indices = @transform_0, window_bounds = array<i64: 1, 1>}, {transform_indices = @transform_1, window_bounds = array<i64: 128, 32>}, {transform_indices = @transform_2, window_bounds = array<i64: 128, 32>}, {transform_indices = @transform_3, window_bounds = array<i64: 1, 128>}, {transform_indices = @transform_4, window_bounds = array<i64: 1, 128>}, {transform_indices = @transform_5, window_bounds = array<i64: 1, 128>}]} {
    %c0 = arith.constant 0 : index
    %c0_0 = arith.constant 0 : index
    %0 = vector.load %arg2[%c0, %c0_0] : memref<128x32xbf16, #tpu.memory_space<vmem>>, vector<128x32xbf16>
    %1 = arith.extf %0 : vector<128x32xbf16> to vector<128x32xf32>
    %c0_1 = arith.constant 0 : index
    %c0_2 = arith.constant 0 : index
    %2 = vector.load %arg3[%c0_1, %c0_2] : memref<128x32xbf16, #tpu.memory_space<vmem>>, vector<128x32xbf16>
    %3 = arith.extf %2 : vector<128x32xbf16> to vector<128x32xf32>
    %4 = arith.mulf %1, %3 : vector<128x32xf32>
    %cst = arith.constant 1.000000e+00 : f32
    %5 = vector.broadcast %cst : f32 to vector<1x32xf32>
    %cst_3 = arith.constant dense<0.000000e+00> : vector<1x128xf32>
    %6 = tpu.matmul %5, %4, %cst_3 {dimension_numbers = #tpu.dot_dimension_numbers<[1], [1], [0], [0], [0, 0, 1, 0], [], []>} : vector<1x32xf32>, vector<128x32xf32>, vector<1x128xf32> -> vector<1x128xf32>
    %c0_4 = arith.constant 0 : index
    %c0_5 = arith.constant 0 : index
    %7 = vector.load %arg4[%c0_4, %c0_5] : memref<1x128xf32, #tpu.memory_space<vmem>>, vector<1x128xf32>
    %8 = arith.addf %6, %7 : vector<1x128xf32>
    %c0_6 = arith.constant 0 : index
    %c0_7 = arith.constant 0 : index
    %9 = memref.load %arg1[%c0_6, %c0_7] : memref<1x1xf32, #tpu.memory_space<smem>>
    %10 = vector.broadcast %9 : f32 to vector<1x128xf32>
    %11 = arith.addf %8, %10 : vector<1x128xf32>
    %c0_8 = arith.constant 0 : index
    %c0_9 = arith.constant 0 : index
    %12 = vector.load %arg5[%c0_8, %c0_9] : memref<1x128xf32, #tpu.memory_space<vmem>>, vector<1x128xf32>
    tpu.vector_store %arg5[%c0_8, %c0_9], %11 {strides = array<i32>} : memref<1x128xf32, #tpu.memory_space<vmem>>, vector<1x128xf32>,
    %cst_10 = arith.constant 0.000000e+00 : f32
    %13 = vector.broadcast %cst_10 : f32 to vector<1x128xf32>
    %14 = arith.subf %13, %11 : vector<1x128xf32>
    %15 = math.exp %14 : vector<1x128xf32>
    %cst_11 = arith.constant 1.000000e+00 : f32
    %16 = vector.broadcast %cst_11 : f32 to vector<1x128xf32>
    %17 = arith.addf %16, %15 : vector<1x128xf32>
    %cst_12 = arith.constant 1.000000e+00 : f32
    %18 = vector.broadcast %cst_12 : f32 to vector<1x128xf32>
    %19 = arith.divf %18, %17 : vector<1x128xf32>
    %c0_13 = arith.constant 0 : index
    %c0_14 = arith.constant 0 : index
    %20 = vector.load %arg6[%c0_13, %c0_14] : memref<1x128xf32, #tpu.memory_space<vmem>>, vector<1x128xf32>
    tpu.vector_store %arg6[%c0_13, %c0_14], %19 {strides = array<i32>} : memref<1x128xf32, #tpu.memory_space<vmem>>, vector<1x128xf32>,
    return
  }
  func.func @transform_0(%arg0: i32) -> (i32, i32) {
    %c0_i32 = arith.constant 0 : i32
    %c0_i32_0 = arith.constant 0 : i32
    %c0_i32_1 = arith.constant 0 : i32
    return %c0_i32, %c0_i32_0 : i32, i32
  }
  func.func @transform_1(%arg0: i32) -> (i32, i32) {
    %c0_i32 = arith.constant 0 : i32
    %c0_i32_0 = arith.constant 0 : i32
    return %arg0, %c0_i32 : i32, i32
  }
  func.func @transform_2(%arg0: i32) -> (i32, i32) {
    %c0_i32 = arith.constant 0 : i32
    %c0_i32_0 = arith.constant 0 : i32
    return %arg0, %c0_i32 : i32, i32
  }
  func.func @transform_3(%arg0: i32) -> (i32, i32) {
    %c0_i32 = arith.constant 0 : i32
    %c0_i32_0 = arith.constant 0 : i32
    return %c0_i32, %arg0 : i32, i32
  }
  func.func @transform_4(%arg0: i32) -> (i32, i32) {
    %c0_i32 = arith.constant 0 : i32
    %c0_i32_0 = arith.constant 0 : i32
    return %c0_i32, %arg0 : i32, i32
  }
  func.func @transform_5(%arg0: i32) -> (i32, i32) {
    %c0_i32 = arith.constant 0 : i32
    %c0_i32_0 = arith.constant 0 : i32
    return %c0_i32, %arg0 : i32, i32
  }
}

</mosaic_0001>

<bundles_post_ra>
// kernel: tpu_custom_call.1
= control target key start
LH: loop header
LB: loop body
LE: loop exit
PB: predicated region body
PF: predicated region fallthrough
CT: control target
= control target key end

     0   :  { %12 = vsyncpa [#allocation4], 0  ;;  %v464_v2 = vmov 0.0   ;;  %vm465_vm0 = vmmov 0   ;;  %vm103_vm1 = vcmask 261120   ;;  %s593_s0 = inlined_call_operand.<no memory space> [shape: f32[1,1], index: 0, kind: input, shape index: {}]   ;;  %s594_s1 = inlined_call_operand.vmem [shape: bf16[128,32], index: 1, kind: input, shape index: {}]   ;;  %s595_s2 = inlined_call_operand.vmem [shape: bf16[128,32], index: 2, kind: input, shape index: {}]   ;;  %s596_s3 = inlined_call_operand.vmem [shape: f32[1,128], index: 3, kind: input, shape index: {}]   ;;  %s597_s4 = inlined_call_operand.hbm [shape: f32[1,128], index: 4, kind: output, shape index: {0}]   ;;  %s598_s5 = inlined_call_operand.hbm [shape: f32[1,128], index: 5, kind: output, shape index: {1}]  }
   0x1   :  { %v351_v0 = vld [vmem:[%s594_s1 + $0x38] sm:$0xff]   ;;  %376 = vmatprep.subr.mxu0 %v464_v2  ;;  %408 = vmatprep.mubr.msk.f32.mxu0 %vm465_vm0, %v464_v2  ;;  %v350_v7 = vld [vmem:[%s594_s1 + $0x30] sm:$0xff]  }
   0x2   :  { %v358_v1 = vld [vmem:[%s595_s2 + $0x38] sm:$0xff]   ;;  %v311_v3 = vunpack.c.l.bf16 %v351_v0  ;;  %v312_v4 = vunpack.c.h.bf16 %v351_v0  ;;  %v357_v8 = vld [vmem:[%s595_s2 + $0x30] sm:$0xff]   ;;  %v308_v11 = vunpack.c.h.bf16 %v350_v7 }
   0x3   :  { %v343_v5 = vunpack.c.l.bf16 %v358_v1  ;;  %v344_v6 = vunpack.c.h.bf16 %v358_v1  ;;  %v340_v12 = vunpack.c.h.bf16 %v357_v8 }
   0x5   :  { %v101_v9 = vmul.f32 %v344_v6, %v312_v4  ;;  %v100_v10 = vmul.f32 %v343_v5, %v311_v3 }
   0x7   :  { %377 = vmatpush3.xpose.msk.msra.mxu0 %vm103_vm1, %v101_v9 }
   0x8   :  { %13 = vsyncpa [#allocation6], 0  ;;  %378 = vmatprep.subr.mxu0 %v464_v2  ;;  %v99_v13 = vmul.f32 %v340_v12, %v308_v11  ;;  %v307_v14 = vunpack.c.l.bf16 %v350_v7  ;;  %v339_v15 = vunpack.c.l.bf16 %v357_v8  ;;  %v349_v16 = vld [vmem:[%s594_s1 + $0x28] sm:$0xff]   ;;  %v348_v24 = vld [vmem:[%s594_s1 + $0x20] sm:$0xff]   ;;  %v466_v1 = vmov 1.0   ;;  %s467_s27 = smov [#allocation3]  }
   0x9   :  { %v356_v17 = vld [vmem:[%s595_s2 + $0x28] sm:$0xff]   ;;  %v304_v19 = vunpack.c.h.bf16 %v349_v16  ;;  %v303_v22 = vunpack.c.l.bf16 %v349_v16  ;;  %v355_v25 = vld [vmem:[%s595_s2 + $0x20] sm:$0xff]   ;;  %v300_v27 = vunpack.c.h.bf16 %v348_v24  ;;  %v299_v30 = vunpack.c.l.bf16 %v348_v24  ;;  %v347_v32 = vld [vmem:[%s594_s1 + $0x18] sm:$0xff]   ;;  %s242_s28 = sshll.u32 %s467_s27, 4  ;;  %s243_s28 = int_to_ptr.vmem [resolvable:$true] %s242_s28 }
   0xa   :  { %v98_v18 = vmul.f32 %v339_v15, %v307_v14  ;;  %v336_v20 = vunpack.c.h.bf16 %v356_v17  ;;  %v335_v23 = vunpack.c.l.bf16 %v356_v17  ;;  %v332_v28 = vunpack.c.h.bf16 %v355_v25  ;;  %v354_v33 = vld [vmem:[%s595_s2 + $0x18] sm:$0xff]   ;;  %v346_v40 = vld [vmem:[%s594_s1 + $0x10] sm:$0xff]   ;;  %v345_v48 = vld [vmem:[%s594_s1 + $0x8] sm:$0xff]   ;;  %s420_s29 = scalar_lea.vmem %s243_s28, 16  ;;  %s424_s30 = scalar_lea.vmem %s243_s28, 32 }
   0xb   :  { %379 = vmatpush3.xpose.msk.msra.mxu0 %vm103_vm1, %v100_v10  ;;  %v331_v31 = vunpack.c.l.bf16 %v355_v25  ;;  %v296_v35 = vunpack.c.h.bf16 %v347_v32  ;;  %v328_v36 = vunpack.c.h.bf16 %v354_v33  ;;  %v295_v38 = vunpack.c.l.bf16 %v347_v32  ;;  %v353_v41 = vld [vmem:[%s595_s2 + $0x10] sm:$0xff]   ;;  %v352_v49 = vld [vmem:[%s595_s2 + $0x8] sm:$0xff]   ;;  %v282_v56 = vld [vmem:[%s594_s1] sm:$0xff]   ;;  %p421_p0 = scmp.ne.s32.totalorder %s243_s28, %s420_s29  ;;  %p425_p1 = scmp.lt.s32.totalorder %s243_s28, %s243_s28 }
   0xc   :  { %380 = vmatprep.subr.mxu0 %v464_v2  ;;  %v97_v21 = vmul.f32 %v336_v20, %v304_v19  ;;  %v96_v26 = vmul.f32 %v335_v23, %v303_v22  ;;  %v95_v29 = vmul.f32 %v332_v28, %v300_v27  ;;  %v327_v39 = vunpack.c.l.bf16 %v354_v33  ;;  %v314_v57 = vld [vmem:[%s595_s2] sm:$0xff]   ;;  %p426_p2 = scmp.lt.s32.totalorder %s424_s30, %s420_s29 }
   0xd   :  { %v94_v34 = vmul.f32 %v331_v31, %v299_v30  ;;  %v93_v37 = vmul.f32 %v328_v36, %v296_v35  ;;  %v292_v43 = vunpack.c.h.bf16 %v346_v40  ;;  %v324_v44 = vunpack.c.h.bf16 %v353_v41  ;;  %v102_v3 = vld [vmem:[%s596_s3] sm:$0x1] }
   0xe   :  { %v92_v42 = vmul.f32 %v327_v39, %v295_v38  ;;  %v291_v46 = vunpack.c.l.bf16 %v346_v40  ;;  %v323_v47 = vunpack.c.l.bf16 %v353_v41  ;;  %v288_v51 = vunpack.c.h.bf16 %v345_v48  ;;  %p427_p3 = por %p426_p2, %p425_p1 }
   0xf   :  { %381 = vmatpush3.xpose.msk.msra.mxu0 %vm103_vm1, %v99_v13  ;;  %v91_v45 = vmul.f32 %v324_v44, %v292_v43  ;;  %v320_v52 = vunpack.c.h.bf16 %v352_v49  ;;  %v287_v54 = vunpack.c.l.bf16 %v345_v48  ;;  %v319_v55 = vunpack.c.l.bf16 %v352_v49 }
  0x10   :  { %382 = vmatprep.subr.mxu0 %v464_v2  ;;  %v90_v50 = vmul.f32 %v323_v47, %v291_v46  ;;  %v284_v59 = vunpack.c.h.bf16 %v282_v56  ;;  %v316_v60 = vunpack.c.h.bf16 %v314_v57  ;;  %v283_v62 = vunpack.c.l.bf16 %v282_v56  ;;  %p428_p4 = pnand %p427_p3, %p421_p0 }
  0x11   :  { %v89_v53 = vmul.f32 %v320_v52, %v288_v51  ;;  %v88_v58 = vmul.f32 %v319_v55, %v287_v54  ;;  %v315_v63 = vunpack.c.l.bf16 %v314_v57  ;;  %v226_v5 = vstv %s593_s0 }
  0x12   :  { %v87_v61 = vmul.f32 %v316_v60, %v284_v59 }
  0x13   :  { %383 = vmatpush3.xpose.msk.msra.mxu0 %vm103_vm1, %v98_v18  ;;  %v86_v0 = vmul.f32 %v315_v63, %v283_v62 }
  0x14   :  { %384 = vmatprep.subr.mxu0 %v464_v2 }
  0x17   :  { %385 = vmatpush3.xpose.msk.msra.mxu0 %vm103_vm1, %v97_v21 }
  0x18   :  { %386 = vmatprep.subr.mxu0 %v464_v2 }
  0x1b   :  { %387 = vmatpush3.xpose.msk.msra.mxu0 %vm103_vm1, %v96_v26 }
  0x1c   :  { %388 = vmatprep.subr.mxu0 %v464_v2 }
  0x1f   :  { %389 = vmatpush3.xpose.msk.msra.mxu0 %vm103_vm1, %v95_v29 }
  0x20   :  { %390 = vmatprep.subr.mxu0 %v464_v2 }
  0x23   :  { %391 = vmatpush3.xpose.msk.msra.mxu0 %vm103_vm1, %v94_v34 }
  0x24   :  { %392 = vmatprep.subr.mxu0 %v464_v2 }
  0x27   :  { %393 = vmatpush3.xpose.msk.msra.mxu0 %vm103_vm1, %v93_v37 }
  0x28   :  { %394 = vmatprep.subr.mxu0 %v464_v2 }
  0x2b   :  { %395 = vmatpush3.xpose.msk.msra.mxu0 %vm103_vm1, %v92_v42 }
  0x2c   :  { %396 = vmatprep.subr.mxu0 %v464_v2 }
  0x2f   :  { %397 = vmatpush3.xpose.msk.msra.mxu0 %vm103_vm1, %v91_v45 }
  0x30   :  { %398 = vmatprep.subr.mxu0 %v464_v2 }
  0x33   :  { %399 = vmatpush3.xpose.msk.msra.mxu0 %vm103_vm1, %v90_v50 }
  0x34   :  { %400 = vmatprep.subr.mxu0 %v464_v2 }
  0x37   :  { %401 = vmatpush3.xpose.msk.msra.mxu0 %vm103_vm1, %v89_v53 }
  0x38   :  { %402 = vmatprep.subr.mxu0 %v464_v2 }
  0x3b   :  { %403 = vmatpush3.xpose.msk.msra.mxu0 %vm103_vm1, %v88_v58 }
  0x3c   :  { %404 = vmatprep.subr.mxu0 %v464_v2 }
  0x3f   :  { %405 = vmatpush3.xpose.msk.msra.mxu0 %vm103_vm1, %v87_v61 }
  0x40   :  { %406 = vmatprep.subr.mxu0 %v464_v2 }
  0x43   :  { %407 = vmatpush3.xpose.msk.msra.mxu0 %vm103_vm1, %v86_v0 }
  0x46   :  { %409 = vmatmul.mubr.msk.f32.vlgmr.msra.gmra.mxu0 %vm103_vm1, %v466_v1 }
 0x106   :  { %v221_v4 = vpop.f32.mrf.mxu0 }
 0x107   :  { %v222_v6 = vadd.f32 %v221_v4, %v102_v3 }
 0x108   :  { %v410_v7 = vpop.f32.mrf.mxu0 }
 0x109   :  { %v227_v8 = vadd.f32 %v226_v5, %v222_v6 }
 0x10b   :  { %228 = vst [vmem:[#allocation3] sm:$0x1] %v227_v8  ;;  %v229_v2 = vsub.f32 0.0, %v227_v8 }
 0x10c   :  { %431 = shalt.err (!%p428_p4)
}
 0x10d   :  { %245 = dma.vmem_to_hbm [thread:$0]  %s243_s28, 16, %s597_s4, [#allocation4]   ;;  %v230_v9 = vmul.f32 1.442695, %v229_v2 }
 0x10e   :  { %s468_s0 = smov [#allocation5]  }
 0x10f   :  { %416 = vpow2.f32 %v230_v9  ;;  %s252_s7 = sshll.u32 %s468_s0, 4  ;;  %s253_s7 = int_to_ptr.vmem [resolvable:$true] %s252_s7 }
 0x110   :  { %s440_s8 = scalar_lea.vmem %s253_s7, 16  ;;  %s444_s9 = scalar_lea.vmem %s253_s7, 32 }
 0x111   :  { %p441_p5 = scmp.ne.s32.totalorder %s253_s7, %s440_s8  ;;  %p445_p6 = scmp.lt.s32.totalorder %s253_s7, %s253_s7 }
 0x112   :  { %p446_p7 = scmp.lt.s32.totalorder %s444_s9, %s440_s8 }
 0x114   :  { %p447_p8 = por %p446_p7, %p445_p6 }
 0x116   :  { %p448_p9 = pnand %p447_p8, %p441_p5 }
 0x11c   :  { %v417_v10 = vpop.eup %416 }
 0x11d   :  { %v232_v11 = vadd.f32 1.0, %v417_v10 }
 0x11f   :  { %418 = vrcp.f32 %v232_v11 }
 0x12c   :  { %v419_v12 = vpop.eup %418 }
 0x12d   :  { %235 = vst [vmem:[#allocation5] sm:$0x1] %v419_v12 }
 0x12e   :  { %451 = shalt.err (!%p448_p9)
}
 0x12f   :  { %255 = dma.vmem_to_hbm [thread:$0]  %s253_s7, 16, %s598_s5, [#allocation6]  }
 0x130   :  { %460 = dma.done.wait [#allocation4], 16  }
 0x131   :  { %461 = vsyncadd [#allocation4], 4294967280 }
 0x132   :  { %462 = dma.done.wait [#allocation6], 16  }
 0x133   :  { %463 = vsyncadd [#allocation6], 4294967280 }
 0x134   :  { %262 = vsyncpa [#allocation4], 1 }
 0x135   :  { %263 = vsyncpa [#allocation6], 1 }

</bundles_post_ra>
